<compile_context>
chip_gen: v7x
topology: tpu7x:2x2x1
jax: 0.10.0
libtpu: 0.0.40
codegen_flags: <defaults>
</compile_context>

<pallas_src>
import numpy as np
import jax
import jax.numpy as jnp
from jax import lax
from jax.experimental import pallas as pl
from jax.experimental.pallas import tpu as pltpu

f32 = jnp.float32


def _pick_bblk(B, Hm, Hh):
    """Images per grid step: big enough to amortise the ~0.35us/step overhead,
    but keep >=2 grid steps when possible (v7x has 2 TensorCores) and keep the
    output block sublane-aligned."""
    target = max(1, min(B, -(-256 // Hm)))        # aim for ~256 matmul rows/step
    if B >= 2:
        target = max(1, min(target, B // 2))      # >=2 grid steps for megacore
    bblk = 1
    for d in range(target, 0, -1):
        if B % d == 0:
            bblk = d
            break
    # out-block second-minor dim must be a multiple of 8 unless it spans the array
    if (bblk * Hh) % 8 != 0 and bblk != B:
        bblk = B
    return bblk


def residual_block_thefirstone(x_nchw, params):
    B, Cin, H, W = x_nchw.shape
    Cout = params["w1"].shape[0]
    assert H % 2 == 0 and W % 2 == 0, "avgpool(2x2, stride 2) needs even H, W"
    Hh, Wh = H // 2, W // 2
    Hm = ((H + 2 + 7) // 8) * 8          # rows per image incl. zero margins (8-aligned)
    Lx, Lh, Lo = W * Cin, W * Cout, Wh * Cout

    Bblk = _pick_bblk(B, Hm, Hh)
    steps = B // Bblk
    NR = Bblk * Hm                        # rows per grid-step block
    M = NR - 2                            # rows pushed through the convs
    Bh = Bblk * Hh                        # pooled output rows per block

    # ------------------ host-side packing (plain JAX / numpy constants) -----
    # activations: row b*Hm + 1 + y, lane w*Cin + ci  <->  x[b, ci, y, w]
    x_nhwc = jnp.transpose(x_nchw, (0, 2, 3, 1)).astype(f32)            # [B,H,W,Cin]
    xr = jnp.pad(x_nhwc.reshape(B, H, Lx), ((0, 0), (1, Hm - 1 - H), (0, 0)))
    xr = xr.reshape(B * Hm, Lx)                                         # [B*Hm, Lx]

    # banded weights: horizontal taps + horizontal zero-pad folded into the matrix
    S = np.zeros((3, W, W), np.float32)           # S[kx, w_in, w_out]
    for kx in range(3):
        for wo in range(W):
            wi = wo + kx - 1
            if 0 <= wi < W:
                S[kx, wi, wo] = 1.0
    Sj = jnp.asarray(S)

    def banded(w_tap, Ci, Co):                    # w_tap: [3(kx), Ci, Co]
        m = jnp.einsum("kio,kab->iaob", Sj, w_tap.astype(f32))
        return m.reshape(W * Ci, W * Co)

    w1t = jnp.transpose(params["w1"], (2, 3, 1, 0))     # [ky, kx, Cin, Cout]
    w2t = jnp.transpose(params["w2"], (2, 3, 1, 0))     # [ky, kx, Cout, Cout]
    w1b = jnp.stack([banded(w1t[ky], Cin, Cout) for ky in range(3)])    # [3, Lx, Lh]

    # horizontal half of the 2x2 avg pool folded into conv2 / shortcut weights
    Pm = np.zeros((W, Cout, Wh, Cout), np.float32)
    for w in range(W):
        for c in range(Cout):
            Pm[w, c, w // 2, c] = 1.0
    Pmat = jnp.asarray(Pm.reshape(Lh, Lo))
    w2b = jnp.stack([banded(w2t[ky], Cout, Cout) @ Pmat for ky in range(3)])  # [3, Lh, Lo]

    Q = np.zeros((W, Wh), np.float32)
    for w in range(W):
        Q[w, w // 2] = 1.0
    wp = params["wp"].reshape(Cout, Cin)
    wpb = jnp.einsum("wh,ab->wahb", jnp.asarray(Q),
                     jnp.transpose(wp).astype(f32)).reshape(Lx, Lo)           # [Lx, Lo]

    # vertical half of the pool as a 0/1 row-pooling matrix (per block)
    Pv_np = np.zeros((Bh, M), np.float32)
    for b in range(Bblk):
        for i in range(Hh):
            Pv_np[b * Hh + i, b * Hm + 2 * i] = 1.0
            Pv_np[b * Hh + i, b * Hm + 2 * i + 1] = 1.0
    Pv = jnp.asarray(Pv_np)

    # row-validity mask: zeros h1 at per-image margin rows = conv2's vertical pad
    rr = np.arange(1, 1 + M) % Hm
    rmask = jnp.asarray(((rr >= 1) & (rr <= H)).astype(np.float32)).reshape(M, 1)

    b1 = jnp.tile(params["b1"].astype(f32), W).reshape(1, Lh)
    bout = jnp.tile((params["b2"] + params["bp"]).astype(f32), Wh).reshape(1, Lo)

    # ------------------ the kernel -------------------------------------------
    def kernel(x_ref, w1_ref, b1_ref, w2_ref, wp_ref, pv_ref, bout_ref, rmask_ref,
               out_ref, h1s):
        # conv1 (3x3, pad 1): 3 accumulating dots over vertically shifted rows;
        # the banded weights do the horizontal taps + horizontal zero-pad.
        acc1 = jnp.dot(x_ref[pl.ds(0, M), :], w1_ref[0], preferred_element_type=f32)
        acc1 = acc1 + jnp.dot(x_ref[pl.ds(1, M), :], w1_ref[1], preferred_element_type=f32)
        acc1 = acc1 + jnp.dot(x_ref[pl.ds(2, M), :], w1_ref[2], preferred_element_type=f32)
        h1 = jnp.maximum(acc1 + b1_ref[...], 0.0) * rmask_ref[...]

        # only the two outer margin rows need zeroing; the interior is overwritten
        h1s[0:1, :] = jnp.zeros((1, Lh), f32)
        h1s[NR - 1:NR, :] = jnp.zeros((1, Lh), f32)
        h1s[pl.ds(1, M), :] = h1

        # conv2 (3x3, pad 1) + 1x1 shortcut, with the horizontal half of the
        # 2x2 pool pre-folded into the weights (output lanes are Wh*Cout wide).
        acc2 = jnp.dot(x_ref[pl.ds(1, M), :], wp_ref[...], preferred_element_type=f32)
        acc2 = acc2 + jnp.dot(h1s[pl.ds(0, M), :], w2_ref[0], preferred_element_type=f32)
        acc2 = acc2 + jnp.dot(h1s[pl.ds(1, M), :], w2_ref[1], preferred_element_type=f32)
        acc2 = acc2 + jnp.dot(h1s[pl.ds(2, M), :], w2_ref[2], preferred_element_type=f32)

        # vertical half of the 2x2 avg pool: one tiny matmul with a 0/1 matrix
        pooled = 0.25 * jnp.dot(pv_ref[...], acc2, preferred_element_type=f32)
        out_ref[...] = (pooled + bout_ref[...]).astype(out_ref.dtype)

    in_specs = [
        pl.BlockSpec((NR, Lx), lambda g: (g, 0)),          # packed activations
        pl.BlockSpec((3, Lx, Lh), lambda g: (0, 0, 0)),    # conv1 banded weights
        pl.BlockSpec((1, Lh), lambda g: (0, 0)),           # b1 (lane-tiled)
        pl.BlockSpec((3, Lh, Lo), lambda g: (0, 0, 0)),    # conv2 banded+pooled weights
        pl.BlockSpec((Lx, Lo), lambda g: (0, 0)),          # shortcut 1x1 (pooled)
        pl.BlockSpec((Bh, M), lambda g: (0, 0)),           # vertical-pool matrix
        pl.BlockSpec((1, Lo), lambda g: (0, 0)),           # b2 + bp (lane-tiled)
        pl.BlockSpec((M, 1), lambda g: (0, 0)),            # row-validity mask
    ]
    out_specs = pl.BlockSpec((Bh, Lo), lambda g: (g, 0))
    scratch_shapes = [pltpu.VMEM((NR, Lh), f32)]           # h1 with zero margin rows

    # explicit VMEM budget: double-buffered blocks + scratch, with headroom
    block_bytes = 4 * (NR * Lx + 3 * Lx * Lh + Lh + 3 * Lh * Lo + Lx * Lo
                       + Bh * M + Lo + M + Bh * Lo)
    vmem_limit = int(min(96 << 20, max(16 << 20, 4 * block_bytes + 4 * NR * Lh)))

    flops = steps * (2 * M * (3 * Lx * Lh + 3 * Lh * Lo + Lx * Lo) + 2 * Bh * M * Lo)
    bytes_accessed = 4 * (B * Hm * Lx + 3 * Lx * Lh + 3 * Lh * Lo + Lx * Lo
                          + Bh * M + B * Hh * Lo)

    out_flat = pl.pallas_call(
        kernel,
        out_shape=jax.ShapeDtypeStruct((B * Hh, Lo), f32),
        grid=(steps,),
        in_specs=in_specs,
        out_specs=out_specs,
        scratch_shapes=scratch_shapes,
        compiler_params=pltpu.CompilerParams(
            dimension_semantics=("parallel",),
            vmem_limit_bytes=vmem_limit),
        cost_estimate=pl.CostEstimate(flops=int(flops), transcendentals=0,
                                      bytes_accessed=int(bytes_accessed)),
    )(xr, w1b, b1, w2b, wpb, Pv, bout, rmask)

    # glue: back to PyTorch's NCHW
    return jnp.transpose(out_flat.reshape(B, Hh, Wh, Cout), (0, 3, 1, 2))


def _ref_forward(x, p):
    """Pure-JAX reference mirroring the PyTorch module exactly (NCHW)."""
    def conv(t, w, b, pad):
        out = lax.conv_general_dilated(
            t, w, window_strides=(1, 1), padding=[(pad, pad), (pad, pad)],
            dimension_numbers=("NCHW", "OIHW", "NCHW"),
            precision=lax.Precision.HIGHEST)
        return out + b[None, :, None, None]

    def pool(t):
        return (t[:, :, ::2, ::2] + t[:, :, 1::2, ::2]
                + t[:, :, ::2, 1::2] + t[:, :, 1::2, 1::2]) / 4.0

    shortcut = conv(pool(x), p["wp"], p["bp"], 0)
    out = conv(x, p["w1"], p["b1"], 1)
    out = jax.nn.relu(out)
    out = conv(out, p["w2"], p["b2"], 1)
    out = pool(out)
    return out + shortcut


if __name__ == "__main__":
    B, Cin, Cout, H, W = 2, 4, 8, 16, 16
    key = jax.random.PRNGKey(0)
    ks = jax.random.split(key, 7)
    params = {
        "w1": jax.random.normal(ks[0], (Cout, Cin, 3, 3), jnp.float32) * 0.1,
        "b1": jax.random.normal(ks[1], (Cout,), jnp.float32) * 0.1,
        "w2": jax.random.normal(ks[2], (Cout, Cout, 3, 3), jnp.float32) * 0.1,
        "b2": jax.random.normal(ks[3], (Cout,), jnp.float32) * 0.1,
        "wp": jax.random.normal(ks[4], (Cout, Cin, 1, 1), jnp.float32) * 0.1,
        "bp": jax.random.normal(ks[5], (Cout,), jnp.float32) * 0.1,
    }
    x = jax.random.normal(ks[6], (B, Cin, H, W), jnp.float32)

    out = jax.block_until_ready(residual_block_thefirstone(x, params))
    ref = _ref_forward(x, params)
    assert out.shape == ref.shape == (B, Cout, H // 2, W // 2)
    err = float(jnp.max(jnp.abs(out - ref)))
    if err > 2e-2:
        raise AssertionError(f"kernel mismatch vs reference: max abs err = {err}")
    print("KERNEL_OK")
</pallas_src>

<mosaic_0001>
module attributes {stable_mosaic.version = 11 : i64} {
  func.func @kernel(%arg0: i32, %arg1: memref<24x64xf32, #tpu.memory_space<vmem>>, %arg2: memref<3x64x128xf32, #tpu.memory_space<vmem>>, %arg3: memref<1x128xf32, #tpu.memory_space<vmem>>, %arg4: memref<3x128x64xf32, #tpu.memory_space<vmem>>, %arg5: memref<64x64xf32, #tpu.memory_space<vmem>>, %arg6: memref<8x22xf32, #tpu.memory_space<vmem>>, %arg7: memref<1x64xf32, #tpu.memory_space<vmem>>, %arg8: memref<22x1xf32, #tpu.memory_space<vmem>>, %arg9: memref<8x64xf32, #tpu.memory_space<vmem>>, %arg10: memref<24x128xf32, #tpu.memory_space<vmem>>) attributes {dimension_semantics = [#tpu.dimension_semantics<parallel>], iteration_bounds = array<i64: 2>, scalar_prefetch = 0 : i64, scratch_operands = 1 : i64, tpu.core_type = #tpu.core_type<tc>, window_params = [{transform_indices = @transform_0, window_bounds = array<i64: 24, 64>}, {pipeline_mode = #tpu.pipeline_mode<synchronous>, transform_indices = @transform_1, window_bounds = array<i64: 3, 64, 128>}, {pipeline_mode = #tpu.pipeline_mode<synchronous>, transform_indices = @transform_2, window_bounds = array<i64: 1, 128>}, {pipeline_mode = #tpu.pipeline_mode<synchronous>, transform_indices = @transform_3, window_bounds = array<i64: 3, 128, 64>}, {pipeline_mode = #tpu.pipeline_mode<synchronous>, transform_indices = @transform_4, window_bounds = array<i64: 64, 64>}, {pipeline_mode = #tpu.pipeline_mode<synchronous>, transform_indices = @transform_5, window_bounds = array<i64: 8, 22>}, {pipeline_mode = #tpu.pipeline_mode<synchronous>, transform_indices = @transform_6, window_bounds = array<i64: 1, 64>}, {pipeline_mode = #tpu.pipeline_mode<synchronous>, transform_indices = @transform_7, window_bounds = array<i64: 22, 1>}, {transform_indices = @transform_8, window_bounds = array<i64: 8, 64>}]} {
    %c0 = arith.constant 0 : index
    %c0_0 = arith.constant 0 : index
    %0 = vector.load %arg1[%c0, %c0_0] : memref<24x64xf32, #tpu.memory_space<vmem>>, vector<22x64xf32>
    %c0_1 = arith.constant 0 : index
    %c0_2 = arith.constant 0 : index
    %c0_3 = arith.constant 0 : index
    %1 = vector.load %arg2[%c0_1, %c0_2, %c0_3] : memref<3x64x128xf32, #tpu.memory_space<vmem>>, vector<1x64x128xf32>
    %2 = vector.shape_cast %1 : vector<1x64x128xf32> to vector<64x128xf32>
    %cst = arith.constant dense<0.000000e+00> : vector<22x128xf32>
    %3 = tpu.matmul %0, %2, %cst {dimension_numbers = #tpu.dot_dimension_numbers<[1], [0], [0], [1], [0, 0, 1, 1], [], []>} : vector<22x64xf32>, vector<64x128xf32>, vector<22x128xf32> -> vector<22x128xf32>
    %c1 = arith.constant 1 : index
    %c0_4 = arith.constant 0 : index
    %4 = vector.load %arg1[%c1, %c0_4] : memref<24x64xf32, #tpu.memory_space<vmem>>, vector<22x64xf32>
    %c1_5 = arith.constant 1 : index
    %c0_6 = arith.constant 0 : index
    %c0_7 = arith.constant 0 : index
    %5 = vector.load %arg2[%c1_5, %c0_6, %c0_7] : memref<3x64x128xf32, #tpu.memory_space<vmem>>, vector<1x64x128xf32>
    %6 = vector.shape_cast %5 : vector<1x64x128xf32> to vector<64x128xf32>
    %cst_8 = arith.constant dense<0.000000e+00> : vector<22x128xf32>
    %7 = tpu.matmul %4, %6, %cst_8 {dimension_numbers = #tpu.dot_dimension_numbers<[1], [0], [0], [1], [0, 0, 1, 1], [], []>} : vector<22x64xf32>, vector<64x128xf32>, vector<22x128xf32> -> vector<22x128xf32>
    %8 = arith.addf %3, %7 : vector<22x128xf32>
    %c2 = arith.constant 2 : index
    %c0_9 = arith.constant 0 : index
    %9 = vector.load %arg1[%c2, %c0_9] : memref<24x64xf32, #tpu.memory_space<vmem>>, vector<22x64xf32>
    %c2_10 = arith.constant 2 : index
    %c0_11 = arith.constant 0 : index
    %c0_12 = arith.constant 0 : index
    %10 = vector.load %arg2[%c2_10, %c0_11, %c0_12] : memref<3x64x128xf32, #tpu.memory_space<vmem>>, vector<1x64x128xf32>
    %11 = vector.shape_cast %10 : vector<1x64x128xf32> to vector<64x128xf32>
    %cst_13 = arith.constant dense<0.000000e+00> : vector<22x128xf32>
    %12 = tpu.matmul %9, %11, %cst_13 {dimension_numbers = #tpu.dot_dimension_numbers<[1], [0], [0], [1], [0, 0, 1, 1], [], []>} : vector<22x64xf32>, vector<64x128xf32>, vector<22x128xf32> -> vector<22x128xf32>
    %13 = arith.addf %8, %12 : vector<22x128xf32>
    %c0_14 = arith.constant 0 : index
    %c0_15 = arith.constant 0 : index
    %14 = vector.load %arg3[%c0_14, %c0_15] : memref<1x128xf32, #tpu.memory_space<vmem>>, vector<1x128xf32>
    %15 = vector.broadcast %14 : vector<1x128xf32> to vector<22x128xf32>
    %16 = arith.addf %13, %15 : vector<22x128xf32>
    %cst_16 = arith.constant 0.000000e+00 : f32
    %17 = vector.broadcast %cst_16 : f32 to vector<22x128xf32>
    %18 = arith.maximumf %16, %17 : vector<22x128xf32>
    %c0_17 = arith.constant 0 : index
    %c0_18 = arith.constant 0 : index
    %19 = vector.load %arg8[%c0_17, %c0_18] : memref<22x1xf32, #tpu.memory_space<vmem>>, vector<22x1xf32>
    %20 = vector.broadcast %19 : vector<22x1xf32> to vector<22x128xf32>
    %21 = arith.mulf %18, %20 : vector<22x128xf32>
    %cst_19 = arith.constant 0.000000e+00 : f32
    %22 = vector.broadcast %cst_19 : f32 to vector<1x128xf32>
    %c0_20 = arith.constant 0 : index
    %c0_21 = arith.constant 0 : index
    %23 = vector.load %arg10[%c0_20, %c0_21] : memref<24x128xf32, #tpu.memory_space<vmem>>, vector<1x128xf32>
    tpu.vector_store %arg10[%c0_20, %c0_21], %22 {strides = array<i32>} : memref<24x128xf32, #tpu.memory_space<vmem>>, vector<1x128xf32>,
    %cst_22 = arith.constant 0.000000e+00 : f32
    %24 = vector.broadcast %cst_22 : f32 to vector<1x128xf32>
    %c23 = arith.constant 23 : index
    %c0_23 = arith.constant 0 : index
    %25 = vector.load %arg10[%c23, %c0_23] : memref<24x128xf32, #tpu.memory_space<vmem>>, vector<1x128xf32>
    tpu.vector_store %arg10[%c23, %c0_23], %24 {strides = array<i32>} : memref<24x128xf32, #tpu.memory_space<vmem>>, vector<1x128xf32>,
    %c1_24 = arith.constant 1 : index
    %c0_25 = arith.constant 0 : index
    %26 = vector.load %arg10[%c1_24, %c0_25] : memref<24x128xf32, #tpu.memory_space<vmem>>, vector<22x128xf32>
    tpu.vector_store %arg10[%c1_24, %c0_25], %21 {strides = array<i32>} : memref<24x128xf32, #tpu.memory_space<vmem>>, vector<22x128xf32>,
    %c1_26 = arith.constant 1 : index
    %c0_27 = arith.constant 0 : index
    %27 = vector.load %arg1[%c1_26, %c0_27] : memref<24x64xf32, #tpu.memory_space<vmem>>, vector<22x64xf32>
    %c0_28 = arith.constant 0 : index
    %c0_29 = arith.constant 0 : index
    %28 = vector.load %arg5[%c0_28, %c0_29] : memref<64x64xf32, #tpu.memory_space<vmem>>, vector<64x64xf32>
    %cst_30 = arith.constant dense<0.000000e+00> : vector<22x64xf32>
    %29 = tpu.matmul %27, %28, %cst_30 {dimension_numbers = #tpu.dot_dimension_numbers<[1], [0], [0], [1], [0, 0, 1, 1], [], []>} : vector<22x64xf32>, vector<64x64xf32>, vector<22x64xf32> -> vector<22x64xf32>
    %c0_31 = arith.constant 0 : index
    %c0_32 = arith.constant 0 : index
    %30 = vector.load %arg10[%c0_31, %c0_32] : memref<24x128xf32, #tpu.memory_space<vmem>>, vector<22x128xf32>
    %c0_33 = arith.constant 0 : index
    %c0_34 = arith.constant 0 : index
    %c0_35 = arith.constant 0 : index
    %31 = vector.load %arg4[%c0_33, %c0_34, %c0_35] : memref<3x128x64xf32, #tpu.memory_space<vmem>>, vector<1x128x64xf32>
    %32 = vector.shape_cast %31 : vector<1x128x64xf32> to vector<128x64xf32>
    %cst_36 = arith.constant dense<0.000000e+00> : vector<22x64xf32>
    %33 = tpu.matmul %30, %32, %cst_36 {dimension_numbers = #tpu.dot_dimension_numbers<[1], [0], [0], [1], [0, 0, 1, 1], [], []>} : vector<22x128xf32>, vector<128x64xf32>, vector<22x64xf32> -> vector<22x64xf32>
    %34 = arith.addf %29, %33 : vector<22x64xf32>
    %c1_37 = arith.constant 1 : index
    %c0_38 = arith.constant 0 : index
    %35 = vector.load %arg10[%c1_37, %c0_38] : memref<24x128xf32, #tpu.memory_space<vmem>>, vector<22x128xf32>
    %c1_39 = arith.constant 1 : index
    %c0_40 = arith.constant 0 : index
    %c0_41 = arith.constant 0 : index
    %36 = vector.load %arg4[%c1_39, %c0_40, %c0_41] : memref<3x128x64xf32, #tpu.memory_space<vmem>>, vector<1x128x64xf32>
    %37 = vector.shape_cast %36 : vector<1x128x64xf32> to vector<128x64xf32>
    %cst_42 = arith.constant dense<0.000000e+00> : vector<22x64xf32>
    %38 = tpu.matmul %35, %37, %cst_42 {dimension_numbers = #tpu.dot_dimension_numbers<[1], [0], [0], [1], [0, 0, 1, 1], [], []>} : vector<22x128xf32>, vector<128x64xf32>, vector<22x64xf32> -> vector<22x64xf32>
    %39 = arith.addf %34, %38 : vector<22x64xf32>
    %c2_43 = arith.constant 2 : index
    %c0_44 = arith.constant 0 : index
    %40 = vector.load %arg10[%c2_43, %c0_44] : memref<24x128xf32, #tpu.memory_space<vmem>>, vector<22x128xf32>
    %c2_45 = arith.constant 2 : index
    %c0_46 = arith.constant 0 : index
    %c0_47 = arith.constant 0 : index
    %41 = vector.load %arg4[%c2_45, %c0_46, %c0_47] : memref<3x128x64xf32, #tpu.memory_space<vmem>>, vector<1x128x64xf32>
    %42 = vector.shape_cast %41 : vector<1x128x64xf32> to vector<128x64xf32>
    %cst_48 = arith.constant dense<0.000000e+00> : vector<22x64xf32>
    %43 = tpu.matmul %40, %42, %cst_48 {dimension_numbers = #tpu.dot_dimension_numbers<[1], [0], [0], [1], [0, 0, 1, 1], [], []>} : vector<22x128xf32>, vector<128x64xf32>, vector<22x64xf32> -> vector<22x64xf32>
    %44 = arith.addf %39, %43 : vector<22x64xf32>
    %c0_49 = arith.constant 0 : index
    %c0_50 = arith.constant 0 : index
    %45 = vector.load %arg6[%c0_49, %c0_50] : memref<8x22xf32, #tpu.memory_space<vmem>>, vector<8x22xf32>
    %cst_51 = arith.constant dense<0.000000e+00> : vector<8x64xf32>
    %46 = tpu.matmul %45, %44, %cst_51 {dimension_numbers = #tpu.dot_dimension_numbers<[1], [0], [0], [1], [0, 0, 1, 1], [], []>} : vector<8x22xf32>, vector<22x64xf32>, vector<8x64xf32> -> vector<8x64xf32>
    %cst_52 = arith.constant 2.500000e-01 : f32
    %47 = vector.broadcast %cst_52 : f32 to vector<8x64xf32>
    %48 = arith.mulf %47, %46 : vector<8x64xf32>
    %c0_53 = arith.constant 0 : index
    %c0_54 = arith.constant 0 : index
    %49 = vector.load %arg7[%c0_53, %c0_54] : memref<1x64xf32, #tpu.memory_space<vmem>>, vector<1x64xf32>
    %50 = vector.broadcast %49 : vector<1x64xf32> to vector<8x64xf32>
    %51 = arith.addf %48, %50 : vector<8x64xf32>
    %c0_55 = arith.constant 0 : index
    %c0_56 = arith.constant 0 : index
    %52 = vector.load %arg9[%c0_55, %c0_56] : memref<8x64xf32, #tpu.memory_space<vmem>>, vector<8x64xf32>
    tpu.vector_store %arg9[%c0_55, %c0_56], %51 {strides = array<i32>} : memref<8x64xf32, #tpu.memory_space<vmem>>, vector<8x64xf32>,
    return
  }
  func.func @transform_0(%arg0: i32) -> (i32, i32) {
    %c0_i32 = arith.constant 0 : i32
    %c0_i32_0 = arith.constant 0 : i32
    return %arg0, %c0_i32 : i32, i32
  }
  func.func @transform_1(%arg0: i32) -> (i32, i32, i32) {
    %c0_i32 = arith.constant 0 : i32
    %c0_i32_0 = arith.constant 0 : i32
    %c0_i32_1 = arith.constant 0 : i32
    %c0_i32_2 = arith.constant 0 : i32
    return %c0_i32, %c0_i32_0, %c0_i32_1 : i32, i32, i32
  }
  func.func @transform_2(%arg0: i32) -> (i32, i32) {
    %c0_i32 = arith.constant 0 : i32
    %c0_i32_0 = arith.constant 0 : i32
    %c0_i32_1 = arith.constant 0 : i32
    return %c0_i32, %c0_i32_0 : i32, i32
  }
  func.func @transform_3(%arg0: i32) -> (i32, i32, i32) {
    %c0_i32 = arith.constant 0 : i32
    %c0_i32_0 = arith.constant 0 : i32
    %c0_i32_1 = arith.constant 0 : i32
    %c0_i32_2 = arith.constant 0 : i32
    return %c0_i32, %c0_i32_0, %c0_i32_1 : i32, i32, i32
  }
  func.func @transform_4(%arg0: i32) -> (i32, i32) {
    %c0_i32 = arith.constant 0 : i32
    %c0_i32_0 = arith.constant 0 : i32
    %c0_i32_1 = arith.constant 0 : i32
    return %c0_i32, %c0_i32_0 : i32, i32
  }
  func.func @transform_5(%arg0: i32) -> (i32, i32) {
    %c0_i32 = arith.constant 0 : i32
    %c0_i32_0 = arith.constant 0 : i32
    %c0_i32_1 = arith.constant 0 : i32
    return %c0_i32, %c0_i32_0 : i32, i32
  }
  func.func @transform_6(%arg0: i32) -> (i32, i32) {
    %c0_i32 = arith.constant 0 : i32
    %c0_i32_0 = arith.constant 0 : i32
    %c0_i32_1 = arith.constant 0 : i32
    return %c0_i32, %c0_i32_0 : i32, i32
  }
  func.func @transform_7(%arg0: i32) -> (i32, i32) {
    %c0_i32 = arith.constant 0 : i32
    %c0_i32_0 = arith.constant 0 : i32
    %c0_i32_1 = arith.constant 0 : i32
    return %c0_i32, %c0_i32_0 : i32, i32
  }
  func.func @transform_8(%arg0: i32) -> (i32, i32) {
    %c0_i32 = arith.constant 0 : i32
    %c0_i32_0 = arith.constant 0 : i32
    return %arg0, %c0_i32 : i32, i32
  }
}

</mosaic_0001>

<bundles_post_ra>
// kernel: tpu_custom_call.1
= control target key start
LH: loop header
LB: loop body
LE: loop exit
PB: predicated region body
PF: predicated region fallthrough
CT: control target
= control target key end

     0   :  { %13 = vsyncpa [#allocation4], 0  ;;  %s2404_s0 = inlined_call_operand.vmem [shape: f32[48,64], index: 0, kind: input, shape index: {}]   ;;  %s2405_s1 = inlined_call_operand.vmem [shape: f32[3,64,128], index: 1, kind: input, shape index: {}]   ;;  %s2406_s2 = inlined_call_operand.vmem [shape: f32[1,128], index: 2, kind: input, shape index: {}]   ;;  %s2407_s3 = inlined_call_operand.vmem [shape: f32[3,128,64], index: 3, kind: input, shape index: {}]   ;;  %s2408_s4 = inlined_call_operand.vmem [shape: f32[64,64], index: 4, kind: input, shape index: {}]   ;;  %s2409_s5 = inlined_call_operand.vmem [shape: f32[8,22], index: 5, kind: input, shape index: {}]   ;;  %s2410_s6 = inlined_call_operand.vmem [shape: f32[1,64], index: 6, kind: input, shape index: {}]   ;;  %s2411_s7 = inlined_call_operand.vmem [shape: f32[22,1], index: 7, kind: input, shape index: {}]   ;;  %s2412_s8 = inlined_call_operand.hbm [shape: f32[16,64], index: 8, kind: output, shape index: {}]  }
   0x1   :  { %15 = vsyncpa [#allocation4 + $0x1], 0  ;;  %s1926_s27 = smov 0   ;;  %s1928_s28 = smov 0  }
   0x2   :  { %s1930_s29 = smov 0   ;;  %s1932_s30 = smov 0  }
   0x3 LB: > { %s1947_s9 = sadd.s32 4294967295, %s1874_s30   ;;  %s1218_s10 = sadd.s32 4294967294, %s1874_s30   ;;  %s1874_s30 = sphi %s1932_s30, %s2418_s30   ;;  %s1870_s29 = sphi %s1930_s29, %s2417_s29   ;;  %s1866_s28 = sphi %s1928_s28, %s2416_s28   ;;  %s1862_s27 = sphi %s1926_s27, %s2415_s27  }
   0x4   : > { %s1951_s11 = sadd.s32 1, %s1874_s30   ;;  %s201_s12 = sadd.s32 1, %s1870_s29 }
   0x5   : > { %s198_s13 = ssub.s32 %s1874_s30, %s1951_s11  ;;  %p211_p0 = scmp.ne.s32.totalorder %s1870_s29, %s1866_s28 }
   0x6   : > { %p199_p1 = scmp.eq.s32.totalorder %s198_s13, 0  ;;  %p212_p2 = scmp.eq.s32.totalorder %s1947_s9, 1 }
   0x7   : > { %p217_p3 = scmp.ne.s32.totalorder %s1866_s28, %s1862_s27  ;;  %p218_p4 = scmp.eq.s32.totalorder %s1218_s10, 1 }
   0x8   : > { %s1962_s14 = scalar_select %p199_p1, %s1870_s29, %s201_s12  }
   0x9   : > { %p1964_p5 = por %p212_p2, %p211_p0  ;;  %p1968_p6 = por %p218_p4, %p217_p3 }
   0xa   : > { %p1221_p7 = scmp.ge.s32.totalorder %s1874_s30, 1  ;;  %p266_p8 = scmp.lt.s32.totalorder %s1874_s30, 3 }
   0xc   : > { %p267_p9 = pnand %p1221_p7, %p266_p8 }
   0xd   : > { %v1224_v0 = vld [vmem:[%s2405_s1 + $0x40] sm:$0xff] (!%p267_p9)  ;;  %v1225_v1 = vld [vmem:[%s2405_s1 + $0x48] sm:$0xff] (!%p267_p9)  ;;  %v1226_v2 = vld [vmem:[%s2405_s1 + $0x50] sm:$0xff] (!%p267_p9)  ;;  %v1876_v3 = vmov (!%p267_p9), 0.0|0.0   ;;  %vm1877_vm0 = vmmov (!%p267_p9), 0   ;;  %v1878_v6 = vmov (!%p267_p9), 0.0  }
   0xe   : > { %270 = sbr.rel (%p267_p9) target bundleno = 772 (0x304), region = 52  ;;  %1629 = vmatprep.subr.bf16.mxu0 (!%p267_p9), %v1876_v3  ;;  %v1630_v4 = vpack.c.bf16 (!%p267_p9), %v1225_v1, %v1224_v0  ;;  %v1227_v5 = vld [vmem:[%s2405_s1 + $0x58] sm:$0xff] (!%p267_p9)  ;;  %1413 = vmatprep.mubr.msk.f32.mxu0 (!%p267_p9), %vm1877_vm0, %v1878_v6  ;;  %646 = vst [vmem:[#allocation2] sm:$0x1] (!%p267_p9), %v1878_v6  ;;  %647 = vst [vmem:[#allocation2 + $0x17] sm:$0x1] (!%p267_p9), %v1878_v6 }
   0xf   : > { %s300_s25 = smul.u32 (!%p267_p9), 3, %s1947_s9  ;;  %v1879_v7 = vmov (!%p267_p9), 0   ;;  %v1633_v8 = vpack.c.bf16 (!%p267_p9), %v1227_v5, %v1226_v2  ;;  %1689 = vmatprep.subr.bf16.mxu1 (!%p267_p9), %v1876_v3  ;;  %v1228_v9 = vld [vmem:[%s2405_s1 + $0x60] sm:$0xff] (!%p267_p9)  ;;  %v1229_v10 = vld [vmem:[%s2405_s1 + $0x68] sm:$0xff] (!%p267_p9)  ;;  %1529 = vmatprep.mubr.msk.f32.mxu1 (!%p267_p9), %vm1877_vm0, %v1878_v6  ;;  %v1230_v12 = vld [vmem:[%s2405_s1 + $0x70] sm:$0xff] (!%p267_p9)  ;;  %vm329_vm1 = vcmask (!%p267_p9), 523264  }
  0x10   : > { %1810 = vset.pattern.permute.xlu0 (!%p267_p9), %v1879_v7  ;;  %1811 = vset.pattern.permute.xlu1 (!%p267_p9), %v1879_v7  ;;  %v1636_v11 = vpack.c.bf16 (!%p267_p9), %v1229_v10, %v1228_v9  ;;  %v1231_v13 = vld [vmem:[%s2405_s1 + $0x78] sm:$0xff] (!%p267_p9)  ;;  %v625_v14 = vld [vmem:[%s2411_s7] sm:$0xff] (!%p267_p9)  ;;  %v627_v15 = vld [vmem:[%s2411_s7 + $0x10] sm:$0x3f] (!%p267_p9)  ;;  %vm1061_vm2 = vcmask (!%p267_p9), 1045504   ;;  %vm1057_vm3 = vcmask (!%p267_p9), 179200  }
  0x11   : > { %1631 = vmatpush3.bf16.msra.mxu0 (!%p267_p9), %v1630_v4  ;;  %p301_p10 = scmp.lt.s32.totalorder (!%p267_p9), %s300_s25, 5  ;;  %630 = vperm.xlu0 (!%p267_p9), %1810, %v625_v14   ;;  %v626_v16 = vld [vmem:[%s2411_s7 + $0x8] sm:$0xff] (!%p267_p9)  ;;  %v1639_v17 = vpack.c.bf16 (!%p267_p9), %v1231_v13, %v1230_v12  ;;  %v309_v18 = vld [vmem:[%s2405_s1] sm:$0xff] (!%p267_p9)  ;;  %v311_v22 = vld [vmem:[%s2405_s1 + $0x10] sm:$0xff] (!%p267_p9)  ;;  %s297_s19 = sand.u32 (!%p267_p9), 1, %s1866_s28  }
  0x12   : > { %1632 = vmatprep.subr.bf16.mxu0 (!%p267_p9), %v1876_v3  ;;  %640 = vperm.xlu1 (!%p267_p9), %1811, %v627_v15   ;;  %v310_v19 = vld [vmem:[%s2405_s1 + $0x8] sm:$0xff] (!%p267_p9)  ;;  %v312_v23 = vld [vmem:[%s2405_s1 + $0x18] sm:$0xff] (!%p267_p9)  ;;  %v313_v26 = vld [vmem:[%s2405_s1 + $0x20] sm:$0xff] (!%p267_p9)  ;;  %s1222_s20 = sshll.u32 (!%p267_p9), %s297_s19, 3  ;;  %s1289_s22 = sshll.u32 (!%p267_p9), %s1947_s9, 7 }
  0x13   : > { %v1642_v21 = vpack.c.bf16 (!%p267_p9), %v310_v19, %v309_v18  ;;  %v1645_v24 = vpack.c.bf16 (!%p267_p9), %v312_v23, %v311_v22  ;;  %v314_v27 = vld [vmem:[%s2405_s1 + $0x28] sm:$0xff] (!%p267_p9)  ;;  %v315_v30 = vld [vmem:[%s2405_s1 + $0x30] sm:$0xff] (!%p267_p9)  ;;  %v316_v31 = vld [vmem:[%s2405_s1 + $0x38] sm:$0xff] (!%p267_p9)  ;;  %s299_s23 = scalar_lea.vmem (!%p267_p9), [#allocation3], %s1222_s20  ;;  %s2361_s12 = scalar_lea.hbm (!%p267_p9), %s2412_s8, %s1289_s22 }
  0x14   : > { %v1648_v28 = vpack.c.bf16 (!%p267_p9), %v314_v27, %v313_v26  ;;  %v1651_v32 = vpack.c.bf16 (!%p267_p9), %v316_v31, %v315_v30  ;;  %v1238_v33 = vld [vmem:[%s2405_s1 + $0x80] sm:$0xff] (!%p267_p9)  ;;  %v1239_v34 = vld [vmem:[%s2405_s1 + $0x88] sm:$0xff] (!%p267_p9)  ;;  %v1240_v37 = vld [vmem:[%s2405_s1 + $0x90] sm:$0xff] (!%p267_p9)  ;;  %s1159_s24 = sshll.u32 (!%p267_p9), %s299_s23, 4  ;;  %s1146_s13 = scalar_lea.sflag (!%p267_p9), [#allocation4], %s297_s19  ;;  %s2363_s24 = int_to_ptr.vmem [resolvable:$true] %s1159_s24 }
  0x15   : > { %s2420_s25 = smov (!%p301_p10, %s300_s25), 5  ;;  %1634 = vmatpush3.bf16.msra.mxu0 %v1633_v8  ;;  %635 = vperm.xlu0 %1810, %v626_v16   ;;  %v1654_v36 = vpack.c.bf16 %v1239_v34, %v1238_v33  ;;  %v1241_v38 = vld [vmem:[%s2405_s1 + $0x98] sm:$0xff]  ;;  %v1242_v41 = vld [vmem:[%s2405_s1 + $0xa0] sm:$0xff]  ;;  %v1243_v42 = vld [vmem:[%s2405_s1 + $0xa8] sm:$0xff]  ;;  %s1812_s17 = scalar_lea.vmem %s2363_s24, 128 }
  0x16   : > { %1635 = vmatprep.subr.bf16.mxu0 %v1876_v3  ;;  %s1223_s26 = sshll.u32 %s2420_s25, 3  ;;  %v1657_v40 = vpack.c.bf16 %v1241_v38, %v1240_v37  ;;  %v1660_v44 = vpack.c.bf16 %v1243_v42, %v1242_v41  ;;  %v1244_v45 = vld [vmem:[%s2405_s1 + $0xb0] sm:$0xff]  ;;  %v1245_v46 = vld [vmem:[%s2405_s1 + $0xb8] sm:$0xff]  ;;  %v654_v51 = vld [vmem:[%s2408_s4] sm:$0xff]  ;;  %p1813_p11 = scmp.ne.s32.totalorder %s2363_s24, %s1812_s17 }
  0x17   : > { %s2022_s18 = scalar_lea.vmem %s2404_s0, %s1223_s26  ;;  %v1663_v47 = vpack.c.bf16 %v1245_v46, %v1244_v45  ;;  %v655_v52 = vld [vmem:[%s2408_s4 + $0x8] sm:$0xff]  ;;  %v656_v54 = vld [vmem:[%s2408_s4 + $0x10] sm:$0xff]  ;;  %v657_v55 = vld [vmem:[%s2408_s4 + $0x18] sm:$0xff]  ;;  %s1880_s9 = smov [#allocation3]  }
  0x18   : > { %v2031_v20 = vld [vmem:[%s2022_s18 + $0x1] sm:$0xff]  ;;  %v2045_v25 = vld [vmem:[%s2022_s18 + $0x9] sm:$0xff]  ;;  %v319_v29 = vld [vmem:[%s2022_s18 + $0x11] sm:$0x3f]  ;;  %v1690_v53 = vpack.c.bf16 %v655_v52, %v654_v51  ;;  %v1693_v56 = vpack.c.bf16 %v657_v55, %v656_v54  ;;  %p1814_p12 = pnand %p1813_p11, %p1964_p5 }
  0x19   : > { %1637 = vmatpush3.bf16.msra.mxu0 %v1636_v11  ;;  %v306_v35 = vld [vmem:[%s2022_s18] sm:$0xff]  ;;  %v307_v39 = vld [vmem:[%s2022_s18 + $0x8] sm:$0xff]  ;;  %v308_v43 = vld [vmem:[%s2022_s18 + $0x10] sm:$0x3f] }
  0x1a   : > { %1638 = vmatprep.subr.bf16.mxu0 %v1876_v3  ;;  %v508_v48 = vld [vmem:[%s2022_s18 + $0x2] sm:$0xff]  ;;  %v509_v49 = vld [vmem:[%s2022_s18 + $0xa] sm:$0xff]  ;;  %v510_v50 = vld [vmem:[%s2022_s18 + $0x12] sm:$0x3f]  ;;  %1691 = vmatpush3.bf16.msra.mxu1 %v1690_v53  ;;  %p1815_p13 = pneg %p1814_p12 }
  0x1b   : > { %1692 = vmatprep.subr.bf16.mxu1 %v1876_v3  ;;  %v658_v57 = vld [vmem:[%s2408_s4 + $0x20] sm:$0xff]  ;;  %v659_v58 = vld [vmem:[%s2408_s4 + $0x28] sm:$0xff]  ;;  %v660_v60 = vld [vmem:[%s2408_s4 + $0x30] sm:$0xff] }
  0x1c   : > { %v1696_v59 = vpack.c.bf16 %v659_v58, %v658_v57  ;;  %v661_v61 = vld [vmem:[%s2408_s4 + $0x38] sm:$0xff]  ;;  %v1253_v63 = vld [vmem:[%s2407_s3 + $0x80] sm:$0xff]  ;;  %v1254_v0 = vld [vmem:[%s2407_s3 + $0x88] sm:$0xff] }
  0x1d   : > { %1640 = vmatpush3.bf16.msra.mxu0 %v1639_v17  ;;  %v1699_v62 = vpack.c.bf16 %v661_v61, %v660_v60  ;;  %v1702_v1 = vpack.c.bf16 %v1254_v0, %v1253_v63  ;;  %v1255_v2 = vld [vmem:[%s2407_s3 + $0x90] sm:$0xff]  ;;  %v1256_v4 = vld [vmem:[%s2407_s3 + $0x98] sm:$0xff]  ;;  %v1257_v7 = vld [vmem:[%s2407_s3 + $0xa0] sm:$0xff] }
  0x1e   : > { %1641 = vmatprep.subr.bf16.mxu0 %v1876_v3  ;;  %1694 = vmatpush3.bf16.msra.mxu1 %v1693_v56  ;;  %v1705_v5 = vpack.c.bf16 %v1256_v4, %v1255_v2  ;;  %v1258_v8 = vld [vmem:[%s2407_s3 + $0xa8] sm:$0xff]  ;;  %v665_v9 = vld [vmem:[%s2407_s3] sm:$0xff]  ;;  %v1259_v13 = vld [vmem:[%s2407_s3 + $0xb0] sm:$0xff] }
  0x1f   : > { %1695 = vmatprep.subr.bf16.mxu1 %v1876_v3  ;;  %v666_v10 = vld [vmem:[%s2407_s3 + $0x8] sm:$0xff]  ;;  %v1708_v11 = vpack.c.bf16 %v1258_v8, %v1257_v7  ;;  %v1260_v14 = vld [vmem:[%s2407_s3 + $0xb8] sm:$0xff]  ;;  %v667_v15 = vld [vmem:[%s2407_s3 + $0x10] sm:$0xff] }
  0x20   : > { %1414 = vmatmul.mubr.msk.f32.vlgmr.msra.gmra.mrb[0].mxu0 %vm329_vm1, %v2031_v20  ;;  %v1666_v12 = vpack.c.bf16 %v666_v10, %v665_v9  ;;  %v668_v16 = vld [vmem:[%s2407_s3 + $0x18] sm:$0xff]  ;;  %v1711_v17 = vpack.c.bf16 %v1260_v14, %v1259_v13  ;;  %v1261_v19 = vld [vmem:[%s2407_s3 + $0xc0] sm:$0xff]  ;;  %v670_v22 = vld [vmem:[%s2407_s3 + $0x28] sm:$0xff] }
  0x21   : > { %1643 = vmatpush3.bf16.msra.mxu0 %v1642_v21  ;;  %1416 = vmatprep.mubr.msk.f32.mxu0 %vm1877_vm0, %v1878_v6  ;;  %v1669_v18 = vpack.c.bf16 %v668_v16, %v667_v15  ;;  %v669_v21 = vld [vmem:[%s2407_s3 + $0x20] sm:$0xff]  ;;  %v672_v26 = vld [vmem:[%s2407_s3 + $0x38] sm:$0xff]  ;;  %v674_v34 = vld [vmem:[%s2407_s3 + $0x48] sm:$0xff] }
  0x22   : > { %1644 = vmatprep.subr.bf16.mxu0 %v1876_v3  ;;  %1697 = vmatpush3.bf16.msra.mxu1 %v1696_v59  ;;  %v1265_v31 = vld [vmem:[%s2407_s3 + $0xe0] sm:$0xff]  ;;  %v1267_v37 = vld [vmem:[%s2407_s3 + $0xf0] sm:$0xff]  ;;  %v1268_v38 = vld [vmem:[%s2407_s3 + $0xf8] sm:$0xff] }
  0x23   : > { %1698 = vmatprep.subr.bf16.mxu1 %v1876_v3  ;;  %v673_v33 = vld [vmem:[%s2407_s3 + $0x40] sm:$0xff]  ;;  %v1723_v41 = vpack.c.bf16 %v1268_v38, %v1267_v37  ;;  %v678_v45 = vld [vmem:[%s2407_s3 + $0x68] sm:$0xff] }
  0x24   : > { %1417 = vmatmul.mubr.msk.f32.gmra.mrb[2].mxu0 %vm329_vm1, %v2045_v25  ;;  %v1249_v2 = vld [vmem:[%s2406_s2] ss:$0 sm:$0xff]  ;;  %v1270_v9 = vld [vmem:[%s2407_s3 + $0x108] sm:$0xff] }
  0x25   : > { %1646 = vmatpush3.bf16.msra.mxu0 %v1645_v24  ;;  %1419 = vmatprep.mubr.msk.f32.mxu0 %vm1877_vm0, %v1878_v6  ;;  %v1672_v24 = vpack.c.bf16 %v670_v22, %v669_v21  ;;  %v1269_v8 = vld [vmem:[%s2407_s3 + $0x100] sm:$0xff] }
  0x26   : > { %1647 = vmatprep.subr.bf16.mxu0 %v1876_v3  ;;  %1700 = vmatpush3.bf16.msra.mxu1 %v1699_v62  ;;  %v1726_v15 = vpack.c.bf16 %v1270_v9, %v1269_v8  ;;  %v1277_v38 = vld [vmem:[%s2407_s3 + $0x140] sm:$0xff] }
  0x27   : > { %1701 = vmatprep.subr.bf16.mxu1 %v1876_v3  ;;  %v1056_v9 = vld [vmem:[%s2409_s5] sm:$0xff] }
  0x28   : > { %1420 = vmatmul.mubr.msk.f32.gmra.mrb[4].mxu0 %vm329_vm1, %v319_v29  ;;  %v1264_v29 = vld [vmem:[%s2407_s3 + $0xd8] sm:$0xff] }
  0x29   : > { %1649 = vmatpush3.bf16.msra.mxu0 %v1648_v28  ;;  %1438 = vmatprep.mubr.msk.f32.mxu0 %vm1877_vm0, %v1878_v6  ;;  %v1263_v28 = vld [vmem:[%s2407_s3 + $0xd0] sm:$0xff] }
  0x2a   : > { %1650 = vmatprep.subr.bf16.mxu0 %v1876_v3  ;;  %1530 = vmatmul.mubr.msk.f32.vlgmr.msra.gmra.mrb[0].mxu1 %vm329_vm1, %v2031_v20  ;;  %v1262_v20 = vld [vmem:[%s2407_s3 + $0xc8] sm:$0xff]  ;;  %v1717_v30 = vpack.c.bf16 %v1264_v29, %v1263_v28  ;;  %v1273_v28 = vld [vmem:[%s2407_s3 + $0x120] sm:$0xff] }
  0x2b   : > { %1703 = vmatpush3.bf16.msra.mxu1 %v1702_v1  ;;  %1532 = vmatprep.mubr.msk.f32.mxu1 %vm1877_vm0, %v1878_v6  ;;  %v1714_v23 = vpack.c.bf16 %v1262_v20, %v1261_v19  ;;  %v1272_v19 = vld [vmem:[%s2407_s3 + $0x118] sm:$0xff]  ;;  %v1274_v29 = vld [vmem:[%s2407_s3 + $0x128] sm:$0xff] }
  0x2c   : > { %1704 = vmatprep.subr.bf16.mxu1 %v1876_v3 }
  0x2d   : > { %1652 = vmatpush3.bf16.msra.mxu0 %v1651_v32  ;;  %v1266_v32 = vld [vmem:[%s2407_s3 + $0xe8] sm:$0xff] }
  0x2e   : > { %1653 = vmatprep.subr.bf16.mxu0 %v1876_v3  ;;  %1533 = vmatmul.mubr.msk.f32.gmra.mrb[2].mxu1 %vm329_vm1, %v2045_v25  ;;  %v671_v25 = vld [vmem:[%s2407_s3 + $0x30] sm:$0xff] }
  0x2f   : > { %1706 = vmatpush3.bf16.msra.mxu1 %v1705_v5  ;;  %1535 = vmatprep.mubr.msk.f32.mxu1 %vm1877_vm0, %v1878_v6  ;;  %v1675_v27 = vpack.c.bf16 %v672_v26, %v671_v25 }
  0x30   : > { %1439 = vmatmul.mubr.msk.f32.vlgmr.msra.gmra.mrb[6].mxu0 %vm329_vm1, %v306_v35  ;;  %1707 = vmatprep.subr.bf16.mxu1 %v1876_v3  ;;  %v1720_v35 = vpack.c.bf16 %v1266_v32, %v1265_v31  ;;  %v1732_v32 = vpack.c.bf16 %v1274_v29, %v1273_v28 }
  0x31   : > { %1655 = vmatpush3.bf16.msra.mxu0 %v1654_v36  ;;  %1441 = vmatprep.mubr.msk.f32.mxu0 %vm1877_vm0, %v1878_v6  ;;  %v1678_v36 = vpack.c.bf16 %v674_v34, %v673_v33  ;;  %v1275_v34 = vld [vmem:[%s2407_s3 + $0x130] sm:$0xff] }
  0x32   : > { %1656 = vmatprep.subr.bf16.mxu0 %v1876_v3 }
  0x33   : > { %1709 = vmatpush3.bf16.msra.mxu1 %v1708_v11 }
  0x34   : > { %1442 = vmatmul.mubr.msk.f32.gmra.mrb[8].mxu0 %vm329_vm1, %v307_v39  ;;  %1710 = vmatprep.subr.bf16.mxu1 %v1876_v3  ;;  %v675_v39 = vld [vmem:[%s2407_s3 + $0x50] sm:$0xff] }
  0x35   : > { %1658 = vmatpush3.bf16.msra.mxu0 %v1657_v40  ;;  %1444 = vmatprep.mubr.msk.f32.mxu0 %vm1877_vm0, %v1878_v6  ;;  %v676_v40 = vld [vmem:[%s2407_s3 + $0x58] sm:$0xff] }
  0x36   : > { %1659 = vmatprep.subr.bf16.mxu0 %v1876_v3  ;;  %v1681_v42 = vpack.c.bf16 %v676_v40, %v675_v39  ;;  %v1278_v39 = vld [vmem:[%s2407_s3 + $0x148] sm:$0xff] }
  0x37   : > { %1712 = vmatpush3.bf16.msra.mxu1 %v1711_v17 }
  0x38   : > { %1445 = vmatmul.mubr.msk.f32.gmra.mrb[10].mxu0 %vm329_vm1, %v308_v43  ;;  %1713 = vmatprep.subr.bf16.mxu1 %v1876_v3  ;;  %v653_v43 = vld [vmem:[%s2022_s18 + $0x11] sm:$0x3f]  ;;  %s1816_s18 = sshll.u32 %s1880_s9, 4  ;;  %s1817_s18 = int_to_ptr.vmem [resolvable:$false] %s1816_s18 }
  0x39   : > { %1661 = vmatpush3.bf16.msra.mxu0 %v1660_v44  ;;  %1463 = vmatprep.mubr.msk.f32.mxu0 %vm1877_vm0, %v1878_v6  ;;  %v677_v44 = vld [vmem:[%s2407_s3 + $0x60] sm:$0xff]  ;;  %s1818_s20 = scalar_lea.vmem %s1817_s18, 256  ;;  %p1819_p0 = scmp.lt.s32.totalorder %s2363_s24, %s1817_s18 }
  0x3a   : > { %1662 = vmatprep.subr.bf16.mxu0 %v1876_v3  ;;  %1536 = vmatmul.mubr.msk.f32.gmra.mrb[4].mxu1 %vm329_vm1, %v653_v43  ;;  %v1684_v46 = vpack.c.bf16 %v678_v45, %v677_v44  ;;  %v1280_v43 = vld [vmem:[%s2407_s3 + $0x158] sm:$0xff]  ;;  %p1820_p1 = scmp.lt.s32.totalorder %s1818_s20, %s1812_s17 }
  0x3b   : > { %1715 = vmatpush3.bf16.msra.mxu1 %v1714_v23  ;;  %1570 = vmatprep.mubr.msk.f32.mxu1 %vm1877_vm0, %v1878_v6 }
  0x3c   : > { %1716 = vmatprep.subr.bf16.mxu1 %v1876_v3  ;;  %p1821_p2 = por %p1820_p1, %p1819_p0 }
  0x3d   : > { %1664 = vmatpush3.bf16.msra.mxu0 %v1663_v47  ;;  %v679_v47 = vld [vmem:[%s2407_s3 + $0x70] sm:$0xff] }
  0x3e   : > { %1665 = vmatprep.subr.bf16.mxu0 %v1876_v3  ;;  %p1822_p3 = pnand %p1821_p2, %p1815_p13 }
  0x3f   : > { %1718 = vmatpush3.bf16.msra.mxu1 %v1717_v30 }
  0x40   : > { %1464 = vmatmul.mubr.msk.f32.vlgmr.msra.gmra.mrb[12].mxu0 %vm329_vm1, %v508_v48  ;;  %1719 = vmatprep.subr.bf16.mxu1 %v1876_v3  ;;  %v680_v48 = vld [vmem:[%s2407_s3 + $0x78] sm:$0xff] }
  0x41   : > { %1466 = vmatprep.mubr.msk.f32.mxu0 %vm1877_vm0, %v1878_v6  ;;  %1667 = vmatpush3.bf16.msra.mxu0 %v1666_v12 }
  0x42   : > { %1668 = vmatprep.subr.bf16.mxu0 %v1876_v3 }
  0x43   : > { %1721 = vmatpush3.bf16.msra.mxu1 %v1720_v35  ;;  %v1276_v35 = vld [vmem:[%s2407_s3 + $0x138] sm:$0xff] }
  0x44   : > { %1467 = vmatmul.mubr.msk.f32.gmra.mrb[14].mxu0 %vm329_vm1, %v509_v49  ;;  %1722 = vmatprep.subr.bf16.mxu1 %v1876_v3  ;;  %v1687_v49 = vpack.c.bf16 %v680_v48, %v679_v47  ;;  %v1735_v37 = vpack.c.bf16 %v1276_v35, %v1275_v34  ;;  %v1281_v47 = vld [vmem:[%s2407_s3 + $0x160] sm:$0xff]  ;;  %v1282_v48 = vld [vmem:[%s2407_s3 + $0x168] sm:$0xff] }
  0x45   : > { %1469 = vmatprep.mubr.msk.f32.mxu0 %vm1877_vm0, %v1878_v6  ;;  %1670 = vmatpush3.bf16.msra.mxu0 %v1669_v18  ;;  %v1271_v18 = vld [vmem:[%s2407_s3 + $0x110] sm:$0xff] }
  0x46   : > { %1671 = vmatprep.subr.bf16.mxu0 %v1876_v3  ;;  %v1729_v25 = vpack.c.bf16 %v1272_v19, %v1271_v18 }
  0x47   : > { %1724 = vmatpush3.bf16.msra.mxu1 %v1723_v41  ;;  %v1738_v41 = vpack.c.bf16 %v1278_v39, %v1277_v38 }
  0x48   : > { %1470 = vmatmul.mubr.msk.f32.gmra.mrb[16].mxu0 %vm329_vm1, %v510_v50  ;;  %1725 = vmatprep.subr.bf16.mxu1 %v1876_v3 }
  0x49   : > { %1504 = vmatprep.mubr.msk.f32.mxu0 %vm1877_vm0, %v1878_v6  ;;  %1673 = vmatpush3.bf16.msra.mxu0 %v1672_v24 }
  0x4a   : > { %1674 = vmatprep.subr.bf16.mxu0 %v1876_v3 }
  0x4d   : > { %1676 = vmatpush3.bf16.msra.mxu0 %v1675_v27 }
  0x4e   : > { %1677 = vmatprep.subr.bf16.mxu0 %v1876_v3 }
  0x51   : > { %1679 = vmatpush3.bf16.msra.mxu0 %v1678_v36 }
  0x52   : > { %1680 = vmatprep.subr.bf16.mxu0 %v1876_v3 }
  0x55   : > { %1682 = vmatpush3.bf16.msra.mxu0 %v1681_v42  ;;  %v1279_v42 = vld [vmem:[%s2407_s3 + $0x150] sm:$0xff] }
  0x56   : > { %1683 = vmatprep.subr.bf16.mxu0 %v1876_v3 }
  0x59   : > { %1685 = vmatpush3.bf16.msra.mxu0 %v1684_v46  ;;  %v1741_v46 = vpack.c.bf16 %v1280_v43, %v1279_v42 }
  0x5a   : > { %1686 = vmatprep.subr.bf16.mxu0 %v1876_v3 }
  0x5d   : > { %1688 = vmatpush3.bf16.msra.mxu0 %v1687_v49  ;;  %v1744_v49 = vpack.c.bf16 %v1282_v48, %v1281_v47 }
  0x5e   : > { %1749 = vmatprep.subr.bf16.mxu0 %v1876_v3 }
  0x90   : > { %v631_v10 = vpop.permute.xlu0 %630 }
  0x91   : > { %v641_v30 = vpop.permute.xlu1 %640 }
  0x94   : > { %v636_v24 = vpop.permute.xlu0 %635 }
  0xf3   : > { %v405_v50 = vpop.f32.mrb[0].mxu0 }
  0xf4   : > { %v1415_v51 = vpop.f32.mrb[1].mxu0 }
  0xf5   : > { %v1284_v51 = vld [vmem:[%s2407_s3 + $0x178] sm:$0xff] }
  0xf7   : > { %v410_v52 = vpop.f32.mrb[2].mxu0 }
  0xf8   : > { %v1418_v53 = vpop.f32.mrb[3].mxu0 }
  0xfb   : > { %v415_v54 = vpop.f32.mrb[4].mxu0 }
  0xfc   : > { %v1421_v55 = vpop.f32.mrb[5].mxu0 }
 0x103   : > { %v494_v56 = vpop.f32.mrb[6].mxu0 }
 0x104   : > { %v495_v57 = vadd.f32 %v494_v56, %v405_v50  ;;  %v1440_v58 = vpop.f32.mrb[7].mxu0  ;;  %v1283_v50 = vld [vmem:[%s2407_s3 + $0x170] sm:$0xff] }
 0x107   : > { %v499_v59 = vpop.f32.mrb[8].mxu0 }
 0x108   : > { %v500_v60 = vadd.f32 %v499_v59, %v410_v52  ;;  %v1443_v61 = vpop.f32.mrb[9].mxu0  ;;  %v1747_v52 = vpack.c.bf16 %v1284_v51, %v1283_v50 }
 0x10b   : > { %v504_v62 = vpop.f32.mrb[10].mxu0 }
 0x10c   : > { %v505_v63 = vadd.f32 %v504_v62, %v415_v54  ;;  %v1446_v0 = vpop.f32.mrb[11].mxu0 }
 0x113   : > { %v595_v1 = vpop.f32.mrb[12].mxu0 }
 0x114   : > { %v609_v4 = vadd.f32 %v595_v1, %v495_v57  ;;  %v1465_v5 = vpop.f32.mrb[13].mxu0 }
 0x116   : > { %v619_v7 = vadd.f32 %v1249_v2, %v609_v4 }
 0x117   : > { %v600_v11 = vpop.f32.mrb[14].mxu0 }
 0x118   : > { %v622_v12 = vmax.f32 %v619_v7, 0.0  ;;  %v610_v13 = vadd.f32 %v600_v11, %v500_v60  ;;  %v1468_v14 = vpop.f32.mrb[15].mxu0  ;;  %v1287_v11 = vld [vmem:[%s2410_s6] ss:$0 sm:$0xff] }
 0x11a   : > { %v643_v16 = vmul.f32 %v631_v10, %v622_v12  ;;  %v620_v17 = vadd.f32 %v1249_v2, %v610_v13 }
 0x11b   : > { %v605_v20 = vpop.f32.mrb[16].mxu0 }
 0x11c   : > { %648 = vst [vmem:[#allocation2 + $0x1] sm:$0xff] %v643_v16  ;;  %v623_v21 = vmax.f32 %v620_v17, 0.0  ;;  %v611_v22 = vadd.f32 %v605_v20, %v505_v63  ;;  %1571 = vmatmul.mubr.f32.vlgmr.msra.gmra.mrb[0].mxu1 %v643_v16  ;;  %v1471_v23 = vpop.f32.mrb[17].mxu0 }
 0x11d   : > { %1727 = vmatpush3.bf16.msra.mxu1 %v1726_v15  ;;  %1573 = vmatprep.mubr.msk.f32.mxu1 %vm1877_vm0, %v1878_v6 }
 0x11e   : > { %v644_v26 = vmul.f32 %v636_v24, %v623_v21  ;;  %v621_v27 = vadd.f32 %v1249_v2, %v611_v22  ;;  %1728 = vmatprep.subr.bf16.mxu1 %v1876_v3 }
 0x120   : > { %649 = vst [vmem:[#allocation2 + $0x9] sm:$0xff] %v644_v26  ;;  %v624_v31 = vmax.f32 %v621_v27, 0.0  ;;  %1574 = vmatmul.mubr.f32.gmra.mrb[2].mxu1 %v644_v26 }
 0x121   : > { %1730 = vmatpush3.bf16.msra.mxu1 %v1729_v25  ;;  %1576 = vmatprep.mubr.msk.f32.mxu1 %vm1877_vm0, %v1878_v6 }
 0x122   : > { %v645_v33 = vmul.f32 %v641_v30, %v624_v31  ;;  %1731 = vmatprep.subr.bf16.mxu1 %v1876_v3 }
 0x123   : > { %v662_v36 = vld [vmem:[#allocation2] sm:$0xff] }
 0x124   : > { %650 = vst [vmem:[#allocation2 + $0x11] sm:$0x3f] %v645_v33  ;;  %1505 = vmatmul.mubr.f32.vlgmr.msra.gmra.mrb[18].mxu0 %v662_v36 }
 0x125   : > { %1507 = vmatprep.mubr.msk.f32.mxu0 %vm1877_vm0, %v1878_v6  ;;  %1733 = vmatpush3.bf16.msra.mxu1 %v1732_v32 }
 0x126   : > { %1734 = vmatprep.subr.bf16.mxu1 %v1876_v3 }
 0x127   : > { %v663_v40 = vld [vmem:[#allocation2 + $0x8] sm:$0xff] }
 0x128   : > { %1508 = vmatmul.mubr.f32.gmra.mrb[20].mxu0 %v663_v40  ;;  %v953_v53 = vld [vmem:[#allocation2 + $0x2] sm:$0xff] }
 0x129   : > { %1510 = vmatprep.mubr.msk.f32.mxu0 %vm1877_vm0, %v1878_v6  ;;  %1736 = vmatpush3.bf16.msra.mxu1 %v1735_v37 }
 0x12a   : > { %1737 = vmatprep.subr.bf16.mxu1 %v1876_v3 }
 0x12b   : > { %v664_v44 = vld [vmem:[#allocation2 + $0x10] sm:$0x3f] }
 0x12c   : > { %v852_v45 = vld [vmem:[#allocation2 + $0x11] sm:$0x3f]  ;;  %1511 = vmatmul.mubr.f32.gmra.mrb[22].mxu0 %v664_v44 }
 0x12d   : > { %1577 = vmatmul.mubr.f32.gmra.mrb[4].mxu1 %v852_v45  ;;  %1626 = vmatprep.mubr.msk.f32.mxu0 %vm1877_vm0, %v1878_v6  ;;  %v954_v54 = vld [vmem:[#allocation2 + $0xa] sm:$0xff]  ;;  %v955_v55 = vld [vmem:[#allocation2 + $0x12] sm:$0x3f] }
 0x12e   : > { %1739 = vmatpush3.bf16.msra.mxu1 %v1738_v41  ;;  %1611 = vmatprep.mubr.msk.f32.mxu1 %vm1877_vm0, %v1878_v6 }
 0x12f   : > { %1740 = vmatprep.subr.bf16.mxu1 %v1876_v3 }
 0x132   : > { %1742 = vmatpush3.bf16.msra.mxu1 %v1741_v46 }
 0x133   : > { %1743 = vmatprep.subr.bf16.mxu1 %v1876_v3 }
 0x136   : > { %1745 = vmatpush3.bf16.msra.mxu1 %v1744_v49 }
 0x137   : > { %1746 = vmatprep.subr.bf16.mxu1 %v1876_v3 }
 0x13a   : > { %1748 = vmatpush3.bf16.msra.mxu1 %v1747_v52 }
 0x13d   : > { %1612 = vmatmul.mubr.f32.vlgmr.msra.gmra.mrb[0].mxu1 %v953_v53 }
 0x13e   : > { %1614 = vmatprep.mubr.msk.f32.mxu1 %vm1877_vm0, %v1878_v6 }
 0x141   : > { %1615 = vmatmul.mubr.f32.gmra.mrb[2].mxu1 %v954_v54 }
 0x142   : > { %1617 = vmatprep.mubr.msk.f32.mxu1 %vm1877_vm0, %v1878_v6 }
 0x145   : > { %1618 = vmatmul.mubr.f32.gmra.mrb[4].mxu1 %v955_v55 }
 0x1f7   : > { %v747_v56 = vpop.f32.mrb[18].mxu0 }
 0x1f8   : > { %v1506_v57 = vpop.f32.mrb[19].mxu0 }
 0x1fb   : > { %v752_v58 = vpop.f32.mrb[20].mxu0 }
 0x1fc   : > { %v1509_v59 = vpop.f32.mrb[21].mxu0 }
 0x1ff   : > { %v757_v60 = vpop.f32.mrb[22].mxu0 }
 0x200   : > { %v1512_v61 = vpop.f32.mrb[23].mxu0 }
 0x210   : > { %v1039_v3 = vpop.f32.mrb[0].mxu1 }
 0x211   : > { %v1752_v62 = vadd.f32 %v1039_v3, %v747_v56  ;;  %v1613_v63 = vpop.f32.mrb[1].mxu1 }
 0x214   : > { %v1044_v0 = vpop.f32.mrb[2].mxu1 }
 0x215   : > { %v1753_v1 = vadd.f32 %v1044_v0, %v752_v58  ;;  %v1616_v2 = vpop.f32.mrb[3].mxu1 }
 0x217   : > { %v1750_v4 = vpack.c.bf16 %v1753_v1, %v1752_v62 }
 0x218   : > { %v1049_v5 = vpop.f32.mrb[4].mxu1 }
 0x219   : > { %v1754_v7 = vadd.f32 %v1049_v5, %v757_v60  ;;  %v1619_v8 = vpop.f32.mrb[5].mxu1  ;;  %1751 = vmatpush3.bf16.msra.mxu0 %v1750_v4 }
 0x21a   : > { %1624 = vmatprep.subr.mxu0 %v1878_v6 }
 0x21d   : > { %1625 = vmatpush3.msk.msra.mxu0 %vm1061_vm2, %v1754_v7 }
 0x21e   : > { %1627 = vmatmul.mubr.msk.f32.vlgmr.msra.gmra.mrb[24].mxu0 %vm1057_vm3, %v1056_v9 }
 0x2f1   : > { %v1131_v10 = vpop.f32.mrb[24].mxu0 }
 0x2f2   : > { %v1135_v6 = vmul.f32 0.25, %v1131_v10  ;;  %v1628_v12 = vpop.f32.mrb[25].mxu0 }
 0x2f4   : > { %v1143_v13 = vadd.f32 %v1287_v11, %v1135_v6 }
 0x2f6   : > { %1144 = vst.msk [vmem:[%s299_s23] sm:$0xff] %vm329_vm1, %v1143_v13 }
 0x2f7   : > { %1825 = shalt.err (!%p1822_p3)
}
 0x2f8   : > { %s1826_s19 = scalar_lea.hbm %s2361_s12, 128  ;;  %s1830_s22 = scalar_lea.hbm %s2412_s8, 256 }
 0x2f9   : > { %p1827_p4 = scmp.ne.s32.totalorder %s2361_s12, %s1826_s19  ;;  %p1831_p9 = scmp.lt.u32.totalorder %s2361_s12, %s2412_s8 }
 0x2fa   : > { %p1832_p10 = scmp.lt.u32.totalorder %s1830_s22, %s1826_s19  ;;  %p1834_p12 = scmp.lt.u32.totalorder %s1826_s19, %s2361_s12 }
 0x2fb   : > { %p1828_p7 = pnand %p1827_p4, %p1964_p5 }
 0x2fc   : > { %p1833_p11 = por %p1832_p10, %p1831_p9 }
 0x2fd   : > { %p1829_p8 = pneg %p1828_p7 }
 0x2fe   : > { %p1835_p13 = por %p1834_p12, %p1833_p11 }
 0x300   : > { %p1836_p0 = pnand %p1835_p13, %p1829_p8 }
 0x302   : > { %1839 = shalt.err (!%p1836_p0)
}
 0x303   : > { %1767 = dma.vmem_to_hbm [thread:$0]  (%p1964_p5), %s2363_s24, 128, %s2361_s12, %s1146_s13  }
 0x304 PF: > { %p1773_p1 = scmp.ge.s32.totalorder %s1874_s30, 2  ;;  %s1171_s10 = sand.u32 1, %s1862_s27  }
 0x305   : > { %s1172_s17 = scalar_lea.sflag [#allocation4], %s1171_s10 }
 0x306   : > { %p1770_p2 = pnand %p1773_p1, %p1968_p6 }
 0x308   : > { %1857 = dma.done.wait (!%p1770_p2), %s1172_s17, 128  }
 0x309   : > { %1859 = vsyncadd (!%p1770_p2), %s1172_s17, 4294967168  ;;  %p18_p3 = scmp.ge.s32.totalorder %s1951_s11, 4   ;;  %s2415_s27 = smov %s1866_s28 }
 0x30a   : > { %s2416_s28 = smov %s1870_s29  ;;  %s2417_s29 = smov %s1962_s14 }
 0x30b   : > { %s2418_s30 = smov %s1951_s11  ;;  %20 = sbr.rel (!%p18_p3) target bundleno = 3 (0x3), region = 91 }
 0x312   :  { %1177 = vsyncpa [#allocation4], 1 }
 0x313   :  { %1179 = vsyncpa [#allocation4 + $0x1], 1 }

</bundles_post_ra>
